<compile_context>
chip_gen: v7x
topology: tpu7x:2x2x1
jax: 0.10.0
libtpu: 0.0.40
codegen_flags: <defaults>
</compile_context>

<pallas_src>
import jax
import jax.numpy as jnp
from jax.experimental import pallas as pl
from jax.experimental.pallas import tpu as pltpu


def _round_up(x, m):
    return (x + m - 1) // m * m


def _pick_tk(d_pad, max_tk=2048):
    """Largest multiple of 128 that divides d_pad and is <= max_tk."""
    best = 128
    t = 128
    while t <= min(d_pad, max_tk):
        if d_pad % t == 0:
            best = t
        t += 128
    return best


def _vmem_budget_bytes():
    """Per-generation VMEM budget for tile sizing (headroom below physical)."""
    try:
        cap = int(pltpu.get_tpu_info().vmem_capacity_bytes)
        # ~3/4 of physical: v7x 64MiB -> 48MiB, v5e/v6e 128MiB -> 96MiB.
        return min(max(cap * 3 // 4, 16 << 20), 96 << 20)
    except Exception:
        return 32 << 20  # conservative default, fits every generation


def prepare_fused_params(w_policy, b_policy, w_value, b_value, scale_imgs=True):
    """One-time parameter prep (hoisted out of the per-step forward).

    Returns (w_fused [D_pad, A_pad] bf16, b_fused [1, A_pad] f32, num_actions).
    The 1/255 image scaling is folded into the weights; policy and value heads
    are concatenated into one lane-dense (>=128 wide) matmul.
    Cache/reuse the result between forward calls — weights are fixed in RL eval.

    TODO(synk): folding 1/255 assumes float observations are raw [0, 255];
    callers passing pre-normalized [0, 1] floats must use scale_imgs=False.
    """
    D, A = w_policy.shape
    D_pad = _round_up(D, 128)       # lane-dense / MXU-friendly K
    A_pad = _round_up(A + 1, 128)   # policy logits + value column, lane-dense N

    w_cat = jnp.zeros((D_pad, A_pad), jnp.float32)
    w_cat = w_cat.at[:D, :A].set(w_policy.astype(jnp.float32))
    w_cat = w_cat.at[:D, A].set(w_value[:, 0].astype(jnp.float32))
    if scale_imgs:
        w_cat = w_cat * (1.0 / 255.0)

    b_cat = jnp.zeros((1, A_pad), jnp.float32)
    b_cat = b_cat.at[:, :A].set(b_policy.astype(jnp.float32))
    b_cat = b_cat.at[:, A].set(b_value[0, 0])

    return w_cat.astype(jnp.bfloat16), b_cat, A


def _fused_head_kernel(x_ref, w_ref, b_ref, out_ref):
    # Output block is resident across the K (reduction) axis -> use it directly
    # as the f32 accumulator; initialize with the bias at the first K step.
    @pl.when(pl.program_id(1) == 0)
    def _():
        out_ref[...] = jnp.broadcast_to(b_ref[...], out_ref.shape)

    # uint8 -> f32 -> bf16 (both converts lower cleanly); 0..255 is exact in
    # bf16, so the bf16 MXU pass with f32 accumulation only rounds the weights.
    x = x_ref[...].astype(jnp.float32).astype(jnp.bfloat16)
    out_ref[...] += jnp.dot(x, w_ref[...], preferred_element_type=jnp.float32)


def base_model_forward(obs_nchw, w_fused, b_fused, num_actions):
    """Forward pass of the (minimal concrete) BaseModel.

    obs_nchw : [B, C, H, W] uint8 (raw pixels) or float
    w_fused  : [D_pad, A_pad] bf16 (from prepare_fused_params)
    b_fused  : [1, A_pad] f32
    returns  : (logits [B, A], value [B, 1])
    """
    B, C, H, W = obs_nchw.shape
    D = C * H * W
    D_pad, A_pad = w_fused.shape
    A = num_actions

    # Observations stay uint8 end-to-end (4x less HBM/VMEM traffic than f32);
    # float observations are carried in bf16 (scaling already folded in W).
    x = obs_nchw.reshape(B, D)
    if x.dtype != jnp.uint8:
        x = x.astype(jnp.bfloat16)
    if D_pad != D:
        # TODO(synk): only hit for non-128-aligned D; pads x's K to match the
        # zero-padded weight rows so every K tile is lane-dense.
        x = jnp.pad(x, ((0, 0), (0, D_pad - D)))
    x_item = jnp.dtype(x.dtype).itemsize

    # ---- K tiling: bounds VMEM independent of D (Atari-scale D fits v7x) ----
    tk = _pick_tk(D_pad, max_tk=2048)
    nk = D_pad // tk

    # ---- batch tile sizing against a per-generation VMEM budget -------------
    budget = _vmem_budget_bytes()
    # fixed per step: double-buffered bf16 weight tile + bias (both buffers)
    fixed = 2 * tk * A_pad * 2 + 2 * A_pad * 4
    # per batch row: double-buffered x tile + f32/bf16 cast intermediates
    #                + double-buffered f32 output/accumulator block
    per_row = 2 * tk * x_item + tk * 4 + tk * 2 + 2 * A_pad * 4
    tb = max(budget - fixed, 0) // per_row
    tb = max(32, min(4096, (tb // 32) * 32))       # multiple of 32 (u8 sublanes)
    tb = min(tb, _round_up(B, 32))
    if B >= 64:
        # keep >=2 batch tiles so the "parallel" axis occupies both v7x TCs
        tb = min(tb, _round_up((B + 1) // 2, 32))
    nb = pl.cdiv(B, tb)

    vmem_limit = int(max(16 << 20,
                         min(fixed + tb * per_row + (4 << 20),
                             budget + (4 << 20))))

    out = pl.pallas_call(
        _fused_head_kernel,
        out_shape=jax.ShapeDtypeStruct((B, A_pad), jnp.float32),
        grid=(nb, nk),
        in_specs=[
            pl.BlockSpec((tb, tk), lambda i, k: (i, k)),      # x tile (pipelined)
            pl.BlockSpec((tk, A_pad), lambda i, k: (k, 0)),   # fused bf16 weights
            pl.BlockSpec((1, A_pad), lambda i, k: (0, 0)),    # fused f32 bias
        ],
        out_specs=pl.BlockSpec((tb, A_pad), lambda i, k: (i, 0)),
        compiler_params=pltpu.CompilerParams(
            dimension_semantics=("parallel", "arbitrary"),
            vmem_limit_bytes=vmem_limit,
        ),
    )(x, w_fused, b_fused)

    logits = out[:, :A]
    value = out[:, A:A + 1]
    return logits, value


if __name__ == "__main__":
    # Small shapes consistent with an image observation space:
    # obs_space = Box(0, 255, shape=(4, 16, 16), uint8), action_space = Discrete(8)
    B, C, H, W = 2, 4, 16, 16
    D = C * H * W
    A = 8

    key = jax.random.PRNGKey(0)
    k_obs, k_wp, k_bp, k_wv, k_bv = jax.random.split(key, 5)

    # deterministic synthetic parameters (no checkpoint load)
    obs = jax.random.randint(k_obs, (B, C, H, W), 0, 256, jnp.int32).astype(jnp.uint8)
    w_policy = jax.random.normal(k_wp, (D, A), jnp.float32) * 0.02
    b_policy = jax.random.normal(k_bp, (1, A), jnp.float32) * 0.01
    w_value = jax.random.normal(k_wv, (D, 1), jnp.float32) * 0.02
    b_value = jax.random.normal(k_bv, (1, 1), jnp.float32) * 0.01

    # One-time parameter prep (hoisted out of the per-call path; cache & reuse).
    w_fused, b_fused, num_actions = prepare_fused_params(
        w_policy, b_policy, w_value, b_value, scale_imgs=True)
    w_fused, b_fused = jax.block_until_ready((w_fused, b_fused))

    logits, value = base_model_forward(obs, w_fused, b_fused, num_actions)
    jax.block_until_ready((logits, value))

    # reference check (plain f32 JAX); tolerance loosened for bf16 weight rounding
    x_ref = obs.reshape(B, D).astype(jnp.float32) / 255.0
    logits_ref = x_ref @ w_policy + b_policy
    value_ref = x_ref @ w_value + b_value
    assert jnp.allclose(logits, logits_ref, atol=2e-2, rtol=1e-2), \
        float(jnp.max(jnp.abs(logits - logits_ref)))
    assert jnp.allclose(value, value_ref, atol=2e-2, rtol=1e-2), \
        float(jnp.max(jnp.abs(value - value_ref)))

    print("KERNEL_OK")
</pallas_src>

<mosaic_0001>
module attributes {stable_mosaic.version = 11 : i64} {
  func.func @_fused_head_kernel(%arg0: i32, %arg1: i32, %arg2: memref<32x1024xi8, #tpu.memory_space<vmem>>, %arg3: memref<1024x128xbf16, #tpu.memory_space<vmem>>, %arg4: memref<1x128xf32, #tpu.memory_space<vmem>>, %arg5: memref<32x128xf32, #tpu.memory_space<vmem>>) attributes {dimension_semantics = [#tpu.dimension_semantics<parallel>, #tpu.dimension_semantics<arbitrary>], iteration_bounds = array<i64: 1, 1>, scalar_prefetch = 0 : i64, scratch_operands = 0 : i64, tpu.core_type = #tpu.core_type<tc>, window_params = [{transform_indices = @transform_0, window_bounds = array<i64: 32, 1024>}, {transform_indices = @transform_1, window_bounds = array<i64: 1024, 128>}, {pipeline_mode = #tpu.pipeline_mode<synchronous>, transform_indices = @transform_2, window_bounds = array<i64: 1, 128>}, {transform_indices = @transform_3, window_bounds = array<i64: 32, 128>}]} {
    %c0_i32 = arith.constant 0 : i32
    %0 = arith.cmpi eq, %arg1, %c0_i32 : i32
    %1 = arith.extui %0 : i1 to i32
    %c0_i32_0 = arith.constant 0 : i32
    %2 = arith.cmpi ne, %1, %c0_i32_0 : i32
    scf.if %2 {
      %c0_8 = arith.constant 0 : index
      %c0_9 = arith.constant 0 : index
      %11 = vector.load %arg4[%c0_8, %c0_9] : memref<1x128xf32, #tpu.memory_space<vmem>>, vector<1x128xf32>
      %12 = vector.shape_cast %11 : vector<1x128xf32> to vector<1x128xf32>
      %13 = vector.broadcast %12 : vector<1x128xf32> to vector<32x128xf32>
      %c0_10 = arith.constant 0 : index
      %c0_11 = arith.constant 0 : index
      %14 = vector.load %arg5[%c0_10, %c0_11] : memref<32x128xf32, #tpu.memory_space<vmem>>, vector<32x128xf32>
      tpu.vector_store %arg5[%c0_10, %c0_11], %13 {strides = array<i32>} : memref<32x128xf32, #tpu.memory_space<vmem>>, vector<32x128xf32>,
    } else {
    }
    %c0 = arith.constant 0 : index
    %c0_1 = arith.constant 0 : index
    %3 = vector.load %arg2[%c0, %c0_1] : memref<32x1024xi8, #tpu.memory_space<vmem>>, vector<32x1024xi8>
    %4 = arith.uitofp %3 : vector<32x1024xi8> to vector<32x1024xf32>
    %5 = arith.truncf %4 : vector<32x1024xf32> to vector<32x1024xbf16>
    %c0_2 = arith.constant 0 : index
    %c0_3 = arith.constant 0 : index
    %6 = vector.load %arg5[%c0_2, %c0_3] : memref<32x128xf32, #tpu.memory_space<vmem>>, vector<32x128xf32>
    %c0_4 = arith.constant 0 : index
    %c0_5 = arith.constant 0 : index
    %7 = vector.load %arg3[%c0_4, %c0_5] : memref<1024x128xbf16, #tpu.memory_space<vmem>>, vector<1024x128xbf16>
    %cst = arith.constant dense<0.000000e+00> : vector<32x128xf32>
    %8 = tpu.matmul %5, %7, %cst {dimension_numbers = #tpu.dot_dimension_numbers<[1], [0], [0], [1], [0, 0, 1, 1], [], []>} : vector<32x1024xbf16>, vector<1024x128xbf16>, vector<32x128xf32> -> vector<32x128xf32>
    %9 = arith.addf %6, %8 : vector<32x128xf32>
    %c0_6 = arith.constant 0 : index
    %c0_7 = arith.constant 0 : index
    %10 = vector.load %arg5[%c0_6, %c0_7] : memref<32x128xf32, #tpu.memory_space<vmem>>, vector<32x128xf32>
    tpu.vector_store %arg5[%c0_6, %c0_7], %9 {strides = array<i32>} : memref<32x128xf32, #tpu.memory_space<vmem>>, vector<32x128xf32>,
    return
  }
  func.func @transform_0(%arg0: i32, %arg1: i32) -> (i32, i32) {
    %c0_i32 = arith.constant 0 : i32
    return %arg0, %arg1 : i32, i32
  }
  func.func @transform_1(%arg0: i32, %arg1: i32) -> (i32, i32) {
    %c0_i32 = arith.constant 0 : i32
    %c0_i32_0 = arith.constant 0 : i32
    return %arg1, %c0_i32 : i32, i32
  }
  func.func @transform_2(%arg0: i32, %arg1: i32) -> (i32, i32) {
    %c0_i32 = arith.constant 0 : i32
    %c0_i32_0 = arith.constant 0 : i32
    %c0_i32_1 = arith.constant 0 : i32
    return %c0_i32, %c0_i32_0 : i32, i32
  }
  func.func @transform_3(%arg0: i32, %arg1: i32) -> (i32, i32) {
    %c0_i32 = arith.constant 0 : i32
    %c0_i32_0 = arith.constant 0 : i32
    return %arg0, %c0_i32 : i32, i32
  }
}

</mosaic_0001>

<bundles_post_ra>
// kernel: tpu_custom_call.1
= control target key start
LH: loop header
LB: loop body
LE: loop exit
PB: predicated region body
PF: predicated region fallthrough
CT: control target
= control target key end

     0   :  { %8 = vsyncpa [#allocation3], 0  ;;  %s1395_s0 = inlined_call_operand.hbm [shape: u8[2,1024], index: 0, kind: input, shape index: {}]   ;;  %s1396_s1 = inlined_call_operand.hbm [shape: bf16[1024,128], index: 1, kind: input, shape index: {}]   ;;  %s1397_s2 = inlined_call_operand.vmem [shape: f32[1,128], index: 2, kind: input, shape index: {}]   ;;  %s1398_s3 = inlined_call_operand.hbm [shape: f32[2,128], index: 3, kind: output, shape index: {}]  }
   0x1   :  { %9 = vsyncpa [#allocation6], 0 }
   0x2   :  { %10 = vsyncpa [#allocation4], 0 }
   0x3   :  { %15 = vsyncadd [#allocation3], 896  ;;  %s1316_s12 = smov [#allocation2]   ;;  %s1244_s16 = scalar_lea.hbm %s1395_s0, 128 }
   0x4   :  { %s16_s13 = sshll.u32 %s1316_s12, 4  ;;  %p1245_p0 = scmp.ne.s32.totalorder %s1395_s0, %s1244_s16  ;;  %s17_s13 = int_to_ptr.vmem [resolvable:$true] %s16_s13 }
   0x5   :  { %p1248_p1 = scmp.lt.u32.totalorder %s1244_s16, %s1395_s0 }
   0x7   :  { %p1250_p2 = pnand %p1248_p1, %p1245_p0 }
   0x9   :  { %1253 = shalt.err (!%p1250_p2)
}
   0xa   :  { %s1254_s21 = scalar_lea.vmem %s17_s13, 128  ;;  %s1258_s22 = scalar_lea.vmem %s17_s13, 1024 }
   0xb   :  { %p1255_p3 = scmp.ne.s32.totalorder %s17_s13, %s1254_s21  ;;  %p1259_p4 = scmp.lt.s32.totalorder %s17_s13, %s17_s13 }
   0xc   :  { %p1260_p5 = scmp.lt.s32.totalorder %s1258_s22, %s1254_s21 }
   0xe   :  { %p1261_p6 = por %p1260_p5, %p1259_p4 }
  0x10   :  { %p1262_p7 = pnand %p1261_p6, %p1255_p3 }
  0x12   :  { %1265 = shalt.err (!%p1262_p7)
}
  0x13   :  { %s1317_s23 = smov 128   ;;  %s1318_s24 = smov 8  }
  0x14   :  { %22 = dma.hbm_to_vmem [thread:$0]  %s1395_s0, 128, %s17_s13, [#allocation3], %s1317_s23, %s1317_s23, %s1318_s24  }
  0x15   :  { %s1319_s27 = smov [#allocation5]   ;;  %s1266_s4 = scalar_lea.hbm %s1396_s1, 8192 }
  0x16   :  { %s28_s28 = sshll.u32 %s1319_s27, 4  ;;  %p1267_p8 = scmp.ne.s32.totalorder %s1396_s1, %s1266_s4  ;;  %s29_s28 = int_to_ptr.vmem [resolvable:$true] %s28_s28 }
  0x17   :  { %p1270_p9 = scmp.lt.u32.totalorder %s1266_s4, %s1396_s1 }
  0x19   :  { %p1272_p10 = pnand %p1270_p9, %p1267_p8 }
  0x1b   :  { %1275 = shalt.err (!%p1272_p10)
}
  0x1c   :  { %s1276_s9 = scalar_lea.vmem %s29_s28, 8192  ;;  %p1281_p12 = scmp.lt.s32.totalorder %s29_s28, %s29_s28 }
  0x1d   :  { %p1277_p11 = scmp.ne.s32.totalorder %s29_s28, %s1276_s9  ;;  %p1282_p13 = scmp.lt.s32.totalorder %s1276_s9, %s1276_s9 }
  0x1f   :  { %p1283_p0 = por %p1282_p13, %p1281_p12 }
  0x21   :  { %p1284_p1 = pnand %p1283_p0, %p1277_p11 }
  0x23   :  { %1287 = shalt.err (!%p1284_p1)
}
  0x24   :  { %s1320_s0 = smov 64   ;;  %s1321_s10 = smov 4  }
  0x25   :  { %34 = dma.hbm_to_vmem [thread:$0]  %s1396_s1, 8192, %s29_s28, [#allocation6], %s1320_s0, %s1320_s0, %s1321_s10  }
  0x26   :  { %1310 = dma.done.wait [#allocation3], 1024  }
  0x27   :  { %1311 = vsyncadd [#allocation3], 4294966272 }
  0x28   :  { %1312 = dma.done.wait [#allocation6], 8192  }
  0x29   :  { %1313 = vsyncadd [#allocation6], 4294959104  ;;  %v1168_v0 = vld [vmem:[#allocation5 + $0x40] sm:$0xff]   ;;  %v1172_v4 = vld [vmem:[#allocation5 + $0x48] sm:$0xff]   ;;  %v1322_v24 = vmov 1935823168   ;;  %v72_v26 = vlaneseq }
  0x2a   :  { %v1169_v1 = vld [vmem:[#allocation5 + $0xc0] sm:$0xff]   ;;  %1046 = vmatprep.subr.bf16.mxu0 %v1168_v0  ;;  %v1173_v5 = vld [vmem:[#allocation5 + $0xc8] sm:$0xff]   ;;  %v1176_v8 = vld [vmem:[#allocation5 + $0x50] sm:$0xff]   ;;  %v70_v25 = vunpack.c.l.s4 %v1322_v24 }
  0x2b   :  { %v1170_v2 = vld [vmem:[#allocation5] sm:$0xff]   ;;  %1074 = vmatprep.subr.bf16.mxu1 %v1169_v1  ;;  %v1174_v6 = vld [vmem:[#allocation5 + $0x8] sm:$0xff]   ;;  %v1177_v9 = vld [vmem:[#allocation5 + $0xd0] sm:$0xff]   ;;  %v73_v32 = vshrl.u32 %v72_v26, 7 }
  0x2c   :  { %v1171_v3 = vld [vmem:[#allocation5 + $0x80] sm:$0xff]   ;;  %1047 = vmatpush3.bf16.msra.mxu0 %v1170_v2  ;;  %v1175_v7 = vld [vmem:[#allocation5 + $0x88] sm:$0xff]   ;;  %v1178_v10 = vld [vmem:[#allocation5 + $0x10] sm:$0xff]   ;;  %v71_v31 = vunpack.c.0.s8 %v70_v25 }
  0x2d   :  { %1075 = vmatpush3.bf16.msra.mxu1 %v1171_v3  ;;  %1048 = vmatprep.subr.bf16.mxu0 %v1172_v4  ;;  %v1179_v11 = vld [vmem:[#allocation5 + $0x90] sm:$0xff]   ;;  %v1180_v12 = vld [vmem:[#allocation5 + $0x58] sm:$0xff]   ;;  %v1184_v16 = vld [vmem:[#allocation5 + $0x60] sm:$0xff]  }
  0x2e   :  { %1076 = vmatprep.subr.bf16.mxu1 %v1173_v5  ;;  %v1181_v13 = vld [vmem:[#allocation5 + $0xd8] sm:$0xff]   ;;  %v1185_v17 = vld [vmem:[#allocation5 + $0xe0] sm:$0xff]   ;;  %v1188_v20 = vld [vmem:[#allocation5 + $0x68] sm:$0xff]   ;;  %v1370_v37 = vsub.s32 %v71_v31, %v73_v32 }
  0x2f   :  { %v1182_v14 = vld [vmem:[#allocation5 + $0x18] sm:$0xff]   ;;  %v1186_v18 = vld [vmem:[#allocation5 + $0x20] sm:$0xff]   ;;  %v1189_v21 = vld [vmem:[#allocation5 + $0xe8] sm:$0xff]  }
  0x30   :  { %1049 = vmatpush3.bf16.msra.mxu0 %v1174_v6  ;;  %v1183_v15 = vld [vmem:[#allocation5 + $0x98] sm:$0xff]   ;;  %v1187_v19 = vld [vmem:[#allocation5 + $0xa0] sm:$0xff]   ;;  %v1190_v22 = vld [vmem:[#allocation5 + $0x28] sm:$0xff]  }
  0x31   :  { %1077 = vmatpush3.bf16.msra.mxu1 %v1175_v7  ;;  %1050 = vmatprep.subr.bf16.mxu0 %v1176_v8  ;;  %v1191_v23 = vld [vmem:[#allocation5 + $0xa8] sm:$0xff]   ;;  %v1192_v27 = vld [vmem:[#allocation5 + $0x70] sm:$0xff]   ;;  %v1196_v33 = vld [vmem:[#allocation5 + $0x78] sm:$0xff]  }
  0x32   :  { %1078 = vmatprep.subr.bf16.mxu1 %v1177_v9  ;;  %v1193_v28 = vld [vmem:[#allocation5 + $0xf0] sm:$0xff]   ;;  %v1197_v34 = vld [vmem:[#allocation5 + $0xf8] sm:$0xff]   ;;  %v1200_v38 = vld [vmem:[#allocation2] ss:$8 sps:$4 sm:$0xff]  }
  0x33   :  { %v1194_v29 = vld [vmem:[#allocation5 + $0x30] sm:$0xff]   ;;  %v1198_v35 = vld [vmem:[#allocation5 + $0x38] sm:$0xff]   ;;  %v75_v40 = vrot.slane %v1200_v38, %v1370_v37  ;;  %v1206_v41 = vld [vmem:[#allocation5 + $0x140] sm:$0xff]  }
  0x34   :  { %1051 = vmatpush3.bf16.msra.mxu0 %v1178_v10  ;;  %v1195_v30 = vld [vmem:[#allocation5 + $0xb0] sm:$0xff]   ;;  %v1199_v36 = vld [vmem:[#allocation5 + $0xb8] sm:$0xff]   ;;  %v1207_v43 = vld [vmem:[#allocation5 + $0x1c0] sm:$0xff]  }
  0x35   :  { %1079 = vmatpush3.bf16.msra.mxu1 %v1179_v11  ;;  %1052 = vmatprep.subr.bf16.mxu0 %v1180_v12  ;;  %v1203_v39 = vld [vmem:[#allocation2 + $0x10] ss:$8 sps:$4 sm:$0xff]   ;;  %v131_v44 = vunpack.c.l.u8.bf16 %v75_v40  ;;  %v132_v45 = vunpack.c.h.u8.bf16 %v75_v40  ;;  %v1208_v48 = vld [vmem:[#allocation5 + $0x100] sm:$0xff]   ;;  %v1210_v54 = vld [vmem:[#allocation5 + $0x148] sm:$0xff]  }
  0x36   :  { %1080 = vmatprep.subr.bf16.mxu1 %v1181_v13  ;;  %v91_v42 = vrot.slane %v1203_v39, %v1370_v37  ;;  %v1209_v49 = vld [vmem:[#allocation5 + $0x180] sm:$0xff]   ;;  %v1211_v55 = vld [vmem:[#allocation5 + $0x1c8] sm:$0xff]   ;;  %v1214_v58 = vld [vmem:[#allocation5 + $0x150] sm:$0xff]  }
  0x37   :  { %v1212_v56 = vld [vmem:[#allocation5 + $0x108] sm:$0xff]   ;;  %v1215_v59 = vld [vmem:[#allocation5 + $0x1d0] sm:$0xff]   ;;  %v1218_v62 = vld [vmem:[#allocation5 + $0x158] sm:$0xff]  }
  0x38   :  { %1053 = vmatpush3.bf16.msra.mxu0 %v1182_v14  ;;  %v135_v46 = vunpack.c.l.u8.bf16 %v91_v42  ;;  %v136_v47 = vunpack.c.h.u8.bf16 %v91_v42  ;;  %v1213_v57 = vld [vmem:[#allocation5 + $0x188] sm:$0xff]   ;;  %v1216_v60 = vld [vmem:[#allocation5 + $0x110] sm:$0xff]   ;;  %v1219_v1 = vld [vmem:[#allocation5 + $0x1d8] sm:$0xff]  }
  0x39   :  { %1081 = vmatpush3.bf16.msra.mxu1 %v1183_v15  ;;  %1054 = vmatprep.subr.bf16.mxu0 %v1184_v16  ;;  %v1217_v61 = vld [vmem:[#allocation5 + $0x190] sm:$0xff]   ;;  %v1202_v63 = vld [vmem:[#allocation2 + $0x4] ss:$8 sps:$4 sm:$0xff]   ;;  %v1220_v2 = vld [vmem:[#allocation5 + $0x118] sm:$0xff]  }
  0x3a   :  { %1082 = vmatprep.subr.bf16.mxu1 %v1185_v17  ;;  %v967_v50 = vcombine.high %v131_v44, %v135_v46  ;;  %v969_v51 = vcombine.high %v132_v45, %v136_v47  ;;  %v966_v52 = vcombine.low %v131_v44, %v135_v46  ;;  %v968_v53 = vcombine.low %v132_v45, %v136_v47  ;;  %v1205_v0 = vld [vmem:[#allocation2 + $0x14] ss:$8 sps:$4 sm:$0xff]   ;;  %v1222_v4 = vld [vmem:[#allocation5 + $0x160] sm:$0xff]   ;;  %v1228_v11 = vld [vmem:[#allocation2 + $0x30] ss:$8 sps:$4 sm:$0xff]  }
  0x3b   :  { %v1221_v3 = vld [vmem:[#allocation5 + $0x198] sm:$0xff]   ;;  %v1223_v5 = vld [vmem:[#allocation5 + $0x1e0] sm:$0xff]   ;;  %v82_v8 = vrot.slane %v1202_v63, %v1370_v37  ;;  %v98_v9 = vrot.slane %v1205_v0, %v1370_v37  ;;  %v1230_v12 = vld [vmem:[#allocation5 + $0x168] sm:$0xff]   ;;  %v123_v14 = vrot.slane %v1228_v11, %v1370_v37 }
  0x3c   :  { %1055 = vmatpush3.bf16.msra.mxu0 %v1186_v18  ;;  %775 = vmatprep.mubr.bf16.mxu0 %v967_v50  ;;  %v1224_v6 = vld [vmem:[#allocation5 + $0x120] sm:$0xff]   ;;  %v1231_v15 = vld [vmem:[#allocation5 + $0x1e8] sm:$0xff]   ;;  %v1235_v31 = vld [vmem:[#allocation5 + $0x1f0] sm:$0xff]  }
  0x3d   :  { %1083 = vmatpush3.bf16.msra.mxu1 %v1187_v19  ;;  %1056 = vmatprep.subr.bf16.mxu0 %v1188_v20  ;;  %v1225_v7 = vld [vmem:[#allocation5 + $0x1a0] sm:$0xff]   ;;  %v133_v16 = vunpack.c.l.u8.bf16 %v82_v8  ;;  %v137_v17 = vunpack.c.l.u8.bf16 %v98_v9  ;;  %v134_v18 = vunpack.c.h.u8.bf16 %v82_v8  ;;  %v138_v19 = vunpack.c.h.u8.bf16 %v98_v9  ;;  %v1232_v24 = vld [vmem:[#allocation5 + $0x128] sm:$0xff]   ;;  %v1236_v32 = vld [vmem:[#allocation5 + $0x130] sm:$0xff]  }
  0x3e   :  { %1084 = vmatprep.subr.bf16.mxu1 %v1189_v21  ;;  %824 = vmatprep.mubr.bf16.mxu1 %v969_v51  ;;  %v1226_v10 = vld [vmem:[#allocation2 + $0x20] ss:$8 sps:$4 sm:$0xff]   ;;  %v143_v21 = vunpack.c.l.u8.bf16 %v123_v14  ;;  %v1239_v38 = vld [vmem:[#allocation5 + $0x1f8] sm:$0xff]   ;;  %v1242_v39 = vld [vmem:[#allocation2 + $0x24] ss:$8 sps:$4 sm:$0xff]  }
  0x3f   :  { %v107_v13 = vrot.slane %v1226_v10, %v1370_v37  ;;  %v1233_v25 = vld [vmem:[#allocation5 + $0x1a8] sm:$0xff]   ;;  %v1243_v40 = vld [vmem:[#allocation2 + $0x34] ss:$8 sps:$4 sm:$0xff]   ;;  %v970_v47 = vcombine.low %v133_v16, %v137_v17 }
  0x40   :  { %1057 = vmatpush3.bf16.msra.mxu0 %v1190_v22  ;;  %v1241_v42 = vld [vmem:[#allocation5 + $0x1b8] sm:$0xff]   ;;  %v130_v44 = vrot.slane %v1243_v40, %v1370_v37 }
  0x41   :  { %1085 = vmatpush3.bf16.msra.mxu1 %v1191_v23  ;;  %1058 = vmatprep.subr.bf16.mxu0 %v1192_v27  ;;  %v139_v20 = vunpack.c.l.u8.bf16 %v107_v13  ;;  %v140_v22 = vunpack.c.h.u8.bf16 %v107_v13  ;;  %v144_v23 = vunpack.c.h.u8.bf16 %v123_v14 }
  0x42   :  { %1086 = vmatprep.subr.bf16.mxu1 %v1193_v28  ;;  %v146_v50 = vunpack.c.h.u8.bf16 %v130_v44 }
  0x43   :  { %v975_v26 = vcombine.high %v139_v20, %v143_v21  ;;  %v977_v27 = vcombine.high %v140_v22, %v144_v23  ;;  %v974_v28 = vcombine.low %v139_v20, %v143_v21 }
  0x44   :  { %1059 = vmatpush3.bf16.msra.mxu0 %v1194_v29  ;;  %v976_v29 = vcombine.low %v140_v22, %v144_v23 }
  0x45   :  { %1087 = vmatpush3.bf16.msra.mxu1 %v1195_v30  ;;  %1060 = vmatprep.subr.bf16.mxu0 %v1196_v33  ;;  %v1234_v30 = vld [vmem:[#allocation5 + $0x170] sm:$0xff]   ;;  %v971_v33 = vcombine.high %v133_v16, %v137_v17 }
  0x46   :  { %1088 = vmatprep.subr.bf16.mxu1 %v1197_v34  ;;  %v973_v34 = vcombine.high %v134_v18, %v138_v19 }
  0x48   :  { %1061 = vmatpush3.bf16.msra.mxu0 %v1198_v35  ;;  %v1237_v35 = vld [vmem:[#allocation5 + $0x1b0] sm:$0xff]  }
  0x49   :  { %1089 = vmatpush3.bf16.msra.mxu1 %v1199_v36  ;;  %1102 = vmatprep.subr.bf16.mxu0 %v1206_v41  ;;  %v1238_v36 = vld [vmem:[#allocation5 + $0x178] sm:$0xff]  }
  0x4a   :  { %1130 = vmatprep.subr.bf16.mxu1 %v1207_v43  ;;  %v1240_v41 = vld [vmem:[#allocation5 + $0x138] sm:$0xff]   ;;  %v114_v43 = vrot.slane %v1242_v39, %v1370_v37 }
  0x4b   :  { %776 = vmatmul.mubr.bf16.vlgmr.msra.gmra.mrb[0].mxu0 %v966_v52 }
  0x4c   :  { %825 = vmatmul.mubr.bf16.vlgmr.msra.gmra.mrb[0].mxu1 %v968_v53  ;;  %1103 = vmatpush3.bf16.msra.mxu0 %v1208_v48  ;;  %v141_v45 = vunpack.c.l.u8.bf16 %v114_v43  ;;  %v142_v46 = vunpack.c.h.u8.bf16 %v114_v43  ;;  %v972_v48 = vcombine.low %v134_v18, %v138_v19 }
  0x4d   :  { %1131 = vmatpush3.bf16.msra.mxu1 %v1209_v49  ;;  %1104 = vmatprep.subr.bf16.mxu0 %v1210_v54  ;;  %v145_v49 = vunpack.c.l.u8.bf16 %v130_v44 }
  0x4e   :  { %1132 = vmatprep.subr.bf16.mxu1 %v1211_v55  ;;  %783 = vmatprep.mubr.bf16.mxu0 %v975_v26  ;;  %v981_v52 = vcombine.high %v142_v46, %v146_v50  ;;  %v980_v54 = vcombine.low %v142_v46, %v146_v50 }
  0x4f   :  { %832 = vmatprep.mubr.bf16.mxu1 %v977_v27  ;;  %v979_v51 = vcombine.high %v141_v45, %v145_v49  ;;  %v978_v53 = vcombine.low %v141_v45, %v145_v49 }
  0x50   :  { %1105 = vmatpush3.bf16.msra.mxu0 %v1212_v56 }
  0x51   :  { %1133 = vmatpush3.bf16.msra.mxu1 %v1213_v57  ;;  %1106 = vmatprep.subr.bf16.mxu0 %v1214_v58 }
  0x52   :  { %1134 = vmatprep.subr.bf16.mxu1 %v1215_v59 }
  0x53   :  { %784 = vmatmul.mubr.bf16.gmra.mrb[4].mxu0 %v974_v28 }
  0x54   :  { %1107 = vmatpush3.bf16.msra.mxu0 %v1216_v60  ;;  %833 = vmatmul.mubr.bf16.gmra.mrb[4].mxu1 %v976_v29 }
  0x55   :  { %1135 = vmatpush3.bf16.msra.mxu1 %v1217_v61  ;;  %1108 = vmatprep.subr.bf16.mxu0 %v1218_v62 }
  0x56   :  { %1136 = vmatprep.subr.bf16.mxu1 %v1219_v1  ;;  %873 = vmatprep.mubr.bf16.mxu0 %v971_v33 }
  0x57   :  { %922 = vmatprep.mubr.bf16.mxu1 %v973_v34 }
  0x58   :  { %1109 = vmatpush3.bf16.msra.mxu0 %v1220_v2 }
  0x59   :  { %1137 = vmatpush3.bf16.msra.mxu1 %v1221_v3  ;;  %1110 = vmatprep.subr.bf16.mxu0 %v1222_v4 }
  0x5a   :  { %1138 = vmatprep.subr.bf16.mxu1 %v1223_v5 }
  0x5c   :  { %1111 = vmatpush3.bf16.msra.mxu0 %v1224_v6 }
  0x5d   :  { %1139 = vmatpush3.bf16.msra.mxu1 %v1225_v7  ;;  %1112 = vmatprep.subr.bf16.mxu0 %v1230_v12 }
  0x5e   :  { %1140 = vmatprep.subr.bf16.mxu1 %v1231_v15 }
  0x60   :  { %1113 = vmatpush3.bf16.msra.mxu0 %v1232_v24 }
  0x61   :  { %1141 = vmatpush3.bf16.msra.mxu1 %v1233_v25  ;;  %1114 = vmatprep.subr.bf16.mxu0 %v1234_v30 }
  0x62   :  { %1142 = vmatprep.subr.bf16.mxu1 %v1235_v31  ;;  %v965_v31 = vld [vmem:[%s1397_s2] ss:$0 sm:$0xff] }
  0x64   :  { %1115 = vmatpush3.bf16.msra.mxu0 %v1236_v32 }
  0x65   :  { %1143 = vmatpush3.bf16.msra.mxu1 %v1237_v35  ;;  %1116 = vmatprep.subr.bf16.mxu0 %v1238_v36 }
  0x66   :  { %1144 = vmatprep.subr.bf16.mxu1 %v1239_v38 }
  0x68   :  { %1117 = vmatpush3.bf16.msra.mxu0 %v1240_v41 }
  0x69   :  { %1145 = vmatpush3.bf16.msra.mxu1 %v1241_v42 }
  0x6b   :  { %874 = vmatmul.mubr.bf16.vlgmr.msra.gmra.mrb[8].mxu0 %v970_v47 }
  0x6c   :  { %923 = vmatmul.mubr.bf16.vlgmr.msra.gmra.mrb[8].mxu1 %v972_v48  ;;  %881 = vmatprep.mubr.bf16.mxu0 %v979_v51 }
  0x6d   :  { %930 = vmatprep.mubr.bf16.mxu1 %v981_v52 }
  0x73   :  { %882 = vmatmul.mubr.bf16.gmra.mrb[12].mxu0 %v978_v53 }
  0x74   :  { %931 = vmatmul.mubr.bf16.gmra.mrb[12].mxu1 %v980_v54 }
 0x11e   :  { %v1062_v55 = vpop.f32.mrb[0].mxu0 }
 0x11f   :  { %v1090_v37 = vpop.f32.mrb[0].mxu1  ;;  %v1063_v56 = vpop.f32.mrb[1].mxu0 }
 0x120   :  { %v1091_v57 = vpop.f32.mrb[1].mxu1  ;;  %v1064_v58 = vadd.f32 %v1063_v56, %v1062_v55  ;;  %v1065_v60 = vpop.f32.mrb[2].mxu0 }
 0x121   :  { %v1092_v59 = vadd.f32 %v1091_v57, %v1090_v37  ;;  %v1093_v61 = vpop.f32.mrb[2].mxu1  ;;  %v1066_v62 = vpop.f32.mrb[3].mxu0 }
 0x122   :  { %v1094_v63 = vpop.f32.mrb[3].mxu1  ;;  %v1067_v1 = vadd.f32 %v1066_v62, %v1065_v60 }
 0x123   :  { %v827_v0 = vadd.f32 %v1092_v59, %v1064_v58  ;;  %v1095_v2 = vadd.f32 %v1094_v63, %v1093_v61 }
 0x125   :  { %v830_v3 = vadd.f32 %v1095_v2, %v1067_v1 }
 0x126   :  { %v1068_v4 = vpop.f32.mrb[4].mxu0 }
 0x127   :  { %v1096_v5 = vpop.f32.mrb[4].mxu1  ;;  %v1069_v6 = vpop.f32.mrb[5].mxu0 }
 0x128   :  { %v1097_v7 = vpop.f32.mrb[5].mxu1  ;;  %v1070_v8 = vadd.f32 %v1069_v6, %v1068_v4  ;;  %v1071_v10 = vpop.f32.mrb[6].mxu0 }
 0x129   :  { %v1098_v9 = vadd.f32 %v1097_v7, %v1096_v5  ;;  %v1099_v11 = vpop.f32.mrb[6].mxu1  ;;  %v1072_v12 = vpop.f32.mrb[7].mxu0 }
 0x12a   :  { %v1100_v13 = vpop.f32.mrb[7].mxu1  ;;  %v1073_v15 = vadd.f32 %v1072_v12, %v1071_v10 }
 0x12b   :  { %v835_v14 = vadd.f32 %v1098_v9, %v1070_v8  ;;  %v1101_v16 = vadd.f32 %v1100_v13, %v1099_v11 }
 0x12d   :  { %v838_v17 = vadd.f32 %v1101_v16, %v1073_v15 }
 0x13e   :  { %v1118_v18 = vpop.f32.mrb[8].mxu0 }
 0x13f   :  { %v1146_v19 = vpop.f32.mrb[8].mxu1  ;;  %v1119_v20 = vpop.f32.mrb[9].mxu0 }
 0x140   :  { %v1147_v21 = vpop.f32.mrb[9].mxu1  ;;  %v1120_v22 = vadd.f32 %v1119_v20, %v1118_v18  ;;  %v1121_v24 = vpop.f32.mrb[10].mxu0 }
 0x141   :  { %v1148_v23 = vadd.f32 %v1147_v21, %v1146_v19  ;;  %v1149_v25 = vpop.f32.mrb[10].mxu1  ;;  %v1122_v26 = vpop.f32.mrb[11].mxu0 }
 0x142   :  { %v1150_v27 = vpop.f32.mrb[11].mxu1  ;;  %v876_v28 = vadd.f32 %v1120_v22, %v827_v0  ;;  %v1123_v29 = vadd.f32 %v1122_v26, %v1121_v24 }
 0x143   :  { %v1151_v30 = vadd.f32 %v1150_v27, %v1149_v25 }
 0x144   :  { %v925_v32 = vadd.f32 %v1148_v23, %v876_v28  ;;  %v879_v33 = vadd.f32 %v1123_v29, %v830_v3 }
 0x146   :  { %v939_v34 = vadd.f32 %v965_v31, %v925_v32  ;;  %v928_v35 = vadd.f32 %v1151_v30, %v879_v33  ;;  %v1124_v36 = vpop.f32.mrb[12].mxu0 }
 0x147   :  { %v1152_v38 = vpop.f32.mrb[12].mxu1  ;;  %v1125_v39 = vpop.f32.mrb[13].mxu0 }
 0x148   :  { %v1153_v40 = vpop.f32.mrb[13].mxu1  ;;  %943 = vst [vmem:[#allocation7] sm:$0xff] %v939_v34  ;;  %v940_v41 = vadd.f32 %v965_v31, %v928_v35  ;;  %v1126_v42 = vadd.f32 %v1125_v39, %v1124_v36  ;;  %v1127_v44 = vpop.f32.mrb[14].mxu0 }
 0x149   :  { %v1154_v43 = vadd.f32 %v1153_v40, %v1152_v38  ;;  %v1155_v45 = vpop.f32.mrb[14].mxu1  ;;  %v1128_v46 = vpop.f32.mrb[15].mxu0 }
 0x14a   :  { %v1156_v47 = vpop.f32.mrb[15].mxu1  ;;  %944 = vst [vmem:[#allocation7 + $0x8] sm:$0xff] %v940_v41  ;;  %v884_v48 = vadd.f32 %v1126_v42, %v835_v14  ;;  %v1129_v49 = vadd.f32 %v1128_v46, %v1127_v44 }
 0x14b   :  { %v1157_v50 = vadd.f32 %v1156_v47, %v1155_v45 }
 0x14c   :  { %v933_v51 = vadd.f32 %v1154_v43, %v884_v48  ;;  %v887_v52 = vadd.f32 %v1129_v49, %v838_v17 }
 0x14e   :  { %v941_v53 = vadd.f32 %v965_v31, %v933_v51  ;;  %v936_v54 = vadd.f32 %v1157_v50, %v887_v52 }
 0x150   :  { %945 = vst [vmem:[#allocation7 + $0x10] sm:$0xff] %v941_v53  ;;  %v942_v55 = vadd.f32 %v965_v31, %v936_v54 }
 0x152   :  { %946 = vst [vmem:[#allocation7 + $0x18] sm:$0xff] %v942_v55 }
 0x153   :  { %951 = vsyncadd [#allocation4], 480  ;;  %s1323_s2 = smov [#allocation7]  }
 0x154   :  { %s952_s14 = sshll.u32 %s1323_s2, 4  ;;  %s953_s14 = int_to_ptr.vmem [resolvable:$true] %s952_s14 }
 0x155   :  { %s1288_s15 = scalar_lea.vmem %s953_s14, 32  ;;  %s1292_s16 = scalar_lea.vmem %s953_s14, 512 }
 0x156   :  { %p1289_p2 = scmp.ne.s32.totalorder %s953_s14, %s1288_s15  ;;  %p1293_p3 = scmp.lt.s32.totalorder %s953_s14, %s953_s14 }
 0x157   :  { %p1294_p4 = scmp.lt.s32.totalorder %s1292_s16, %s1288_s15 }
 0x159   :  { %p1295_p5 = por %p1294_p4, %p1293_p3 }
 0x15b   :  { %p1296_p6 = pnand %p1295_p5, %p1289_p2 }
 0x15d   :  { %1299 = shalt.err (!%p1296_p6)
}
 0x15e   :  { %s1300_s19 = scalar_lea.hbm %s1398_s3, 32 }
 0x15f   :  { %p1301_p7 = scmp.ne.s32.totalorder %s1398_s3, %s1300_s19  ;;  %p1304_p8 = scmp.lt.u32.totalorder %s1300_s19, %s1398_s3 }
 0x161   :  { %p1306_p9 = pnand %p1304_p8, %p1301_p7 }
 0x163   :  { %1309 = shalt.err (!%p1306_p9)
}
 0x164   :  { %s1324_s24 = smov 32   ;;  %s1325_s25 = smov 2  }
 0x165   :  { %958 = dma.vmem_to_hbm [thread:$0]  %s953_s14, 32, %s1398_s3, [#allocation4], %s1324_s24, %s1324_s24, %s1325_s25  }
 0x166   :  { %1314 = dma.done.wait [#allocation4], 512  }
 0x167   :  { %1315 = vsyncadd [#allocation4], 4294966784 }
 0x168   :  { %962 = vsyncpa [#allocation3], 1 }
 0x169   :  { %963 = vsyncpa [#allocation6], 1 }
 0x16a   :  { %964 = vsyncpa [#allocation4], 1 }

</bundles_post_ra>
